<compile_context>
chip_gen: v7x
topology: tpu7x:2x2x1
jax: 0.10.0
libtpu: 0.0.40
codegen_flags: <defaults>
</compile_context>

<pallas_src>
import functools
import math

import jax
import jax.numpy as jnp
from jax.experimental import pallas as pl
from jax.experimental.pallas import tpu as pltpu

LANE = 128
SUBLANE = 8
# Per-input, per-pipeline-buffer VMEM budget: 2 inputs x 2 buffers x 2 MiB
# = 8 MiB, comfortably inside the default scoped-VMEM limit on all chips.
_VMEM_BUDGET_PER_BUFFER = 2 * 1024 * 1024


def _ufl_stats_kernel(yp_ref, yt_ref, out_ref, *, eps, gamma):
    """Accumulate vreg-shaped per-sample partial sums.

    yp_ref / yt_ref : VMEM blocks of shape (1, tr, 128), native input dtype.
    out_ref         : VMEM block (1, 4, 8, 128) f32, resident across the chunk
                      (reduction) grid axis; rows = [tp, sum(yt), sum(yp), fbce].
    grid            : (B, num_chunks); batch parallel, chunks arbitrary.
    """
    k = pl.program_id(1)

    @pl.when(k == 0)
    def _():
        out_ref[...] = jnp.zeros_like(out_ref)

    yp = jnp.clip(yp_ref[0].astype(jnp.float32), eps, 1.0 - eps)  # (tr, 128)
    yt = yt_ref[0].astype(jnp.float32)
    one_m_yp = 1.0 - yp

    # CSE'd transcendentals: 2 logs + 1 exp per element (EUP slot), no power.
    log_yp = jnp.log(yp)
    log_1m = jnp.log(one_m_yp)
    # bce = -(yt*log(p) + (1-yt)*log(1-p)) = -(yt*(log(p)-log(1-p)) + log(1-p))
    bce = -(yt * (log_yp - log_1m) + log_1m)
    fbce = jnp.exp(gamma * log_1m) * bce          # (1 - yp)^gamma * bce

    # Fold (tr, 128) -> (8, 128) with plain VPU vreg adds (no XLU traffic);
    # the final cross-lane reduction happens once on the host on a tiny array.
    def fold(x):
        return jnp.sum(x.reshape(-1, SUBLANE, LANE), axis=0)

    out_ref[0, 0] += fold(yt * yp)                # tp
    out_ref[0, 1] += fold(yt)                     # sum(y_true)   (fn = S_yt - tp)
    out_ref[0, 2] += fold(yp)                     # sum(y_pred)   (fp = S_yp - tp)
    out_ref[0, 3] += fold(fbce)                   # focal-bce sum


def _pick_block_rows(r_pad, itemsize, block_rows=None):
    """Largest divisor of r_pad that is a multiple of 8 and fits the budget."""
    cap = max(SUBLANE, _VMEM_BUDGET_PER_BUFFER // (LANE * itemsize))
    if block_rows is not None:
        cap = min(cap, block_rows)
    cap = min(cap, r_pad)
    m = r_pad // SUBLANE                    # r_pad is a multiple of 8
    d = max(1, min(m, cap // SUBLANE))
    while m % d != 0:
        d -= 1
    return d * SUBLANE


def unified_focal_loss(y_pred, y_true, *, weight=0.5, delta=0.6, gamma=0.75,
                       eps=1e-7, block_rows=None):
    """JAX/Pallas equivalent of UnifiedFocalLossSample.forward -> shape (B,)."""
    assert y_pred.shape == y_true.shape
    B = y_pred.shape[0]
    N = int(math.prod(y_pred.shape[1:]))

    # Pad the flattened per-sample size up to a multiple of 8*128 so every
    # block satisfies the (8, 128) layout constraint with no full-extent
    # fallback.  The padded elements' contribution is subtracted analytically.
    n_pad = (-N) % (SUBLANE * LANE)
    yp_f = y_pred.reshape(B, N)
    yt_f = y_true.reshape(B, N)
    if n_pad:
        yp_f = jnp.pad(yp_f, ((0, 0), (0, n_pad)))   # yp_pad=0 -> clamped to eps
        yt_f = jnp.pad(yt_f, ((0, 0), (0, n_pad)))   # yt_pad=0
    R = (N + n_pad) // LANE

    # Stream inputs in their native dtype; the f32 cast happens in-kernel.
    yp3 = yp_f.reshape(B, R, LANE)
    yt3 = yt_f.reshape(B, R, LANE)

    itemsize = max(jnp.dtype(yp3.dtype).itemsize, jnp.dtype(yt3.dtype).itemsize)
    tr = _pick_block_rows(R, itemsize, block_rows)
    num_chunks = R // tr

    kernel = functools.partial(_ufl_stats_kernel, eps=eps, gamma=gamma)

    partials = pl.pallas_call(
        kernel,
        out_shape=jax.ShapeDtypeStruct((B, 4, SUBLANE, LANE), jnp.float32),
        grid_spec=pltpu.PrefetchScalarGridSpec(
            num_scalar_prefetch=0,
            grid=(B, num_chunks),
            in_specs=[
                pl.BlockSpec((1, tr, LANE), lambda b, k: (b, k, 0)),
                pl.BlockSpec((1, tr, LANE), lambda b, k: (b, k, 0)),
            ],
            out_specs=pl.BlockSpec((1, 4, SUBLANE, LANE),
                                   lambda b, k: (b, 0, 0, 0)),
        ),
        compiler_params=pltpu.CompilerParams(
            dimension_semantics=("parallel", "arbitrary")),
    )(yp3, yt3)

    sums = jnp.sum(partials, axis=(2, 3))            # (B, 4) tiny host reduce
    tp, s_yt, s_yp, fbce_sum = sums[:, 0], sums[:, 1], sums[:, 2], sums[:, 3]

    if n_pad:
        # Padded elements are (y_pred=0 -> clamped to eps, y_true=0); subtract
        # their analytically-known contributions to sum(yp) and focal-bce.
        yp_pad = jnp.clip(jnp.float32(0.0), eps, 1.0 - eps)
        log_1m_pad = jnp.log(1.0 - yp_pad)
        s_yp = s_yp - n_pad * yp_pad
        fbce_sum = fbce_sum - n_pad * (jnp.exp(gamma * log_1m_pad) * (-log_1m_pad))

    fn = s_yt - tp
    fp = s_yp - tp
    tversky = (tp + eps) / (tp + delta * fn + (1.0 - delta) * fp + eps)
    focal_tversky = (1.0 - tversky) ** gamma
    focal_bce = fbce_sum / N
    return weight * focal_tversky + (1.0 - weight) * focal_bce   # shape (B,)


def _reference(y_pred, y_true, *, weight=0.5, delta=0.6, gamma=0.75, eps=1e-7):
    """Pure-JAX port of the PyTorch forward (per-sample), for checking."""
    yp = jnp.clip(y_pred.astype(jnp.float32), eps, 1.0 - eps)
    B = yp.shape[0]
    yp_f = yp.reshape(B, -1)
    yt_f = y_true.astype(jnp.float32).reshape(B, -1)
    tp = jnp.sum(yt_f * yp_f, axis=1)
    fn = jnp.sum(yt_f * (1.0 - yp_f), axis=1)
    fp = jnp.sum((1.0 - yt_f) * yp_f, axis=1)
    tversky = (tp + eps) / (tp + delta * fn + (1.0 - delta) * fp + eps)
    focal_tversky = (1.0 - tversky) ** gamma
    bce = -(yt_f * jnp.log(yp_f) + (1.0 - yt_f) * jnp.log(1.0 - yp_f))
    focal_bce = jnp.mean(((1.0 - yp_f) ** gamma) * bce, axis=1)
    return weight * focal_tversky + (1.0 - weight) * focal_bce


if __name__ == "__main__":
    key = jax.random.PRNGKey(0)
    kp, kt = jax.random.split(key)

    # Binary segmentation: single-channel probabilities + binary ground truth.
    B, C, H, W = 2, 1, 16, 16
    y_pred = jax.random.uniform(kp, (B, C, H, W), dtype=jnp.float32)
    y_true = (jax.random.uniform(kt, (B, C, H, W)) > 0.5).astype(jnp.float32)

    loss = jax.block_until_ready(unified_focal_loss(y_pred, y_true))
    ref = jax.block_until_ready(_reference(y_pred, y_true))
    assert loss.shape == (B,), loss.shape
    assert jnp.allclose(loss, ref, rtol=1e-4, atol=1e-5), (loss, ref)

    # Larger input (no padding needed); force small blocks to exercise the
    # multi-chunk resident-accumulator path.
    kp2, kt2 = jax.random.split(jax.random.PRNGKey(1))
    y_pred2 = jax.random.uniform(kp2, (2, 1, 64, 64), dtype=jnp.float32)
    y_true2 = (jax.random.uniform(kt2, (2, 1, 64, 64)) > 0.5).astype(jnp.float32)
    loss2 = jax.block_until_ready(
        unified_focal_loss(y_pred2, y_true2, block_rows=8))
    ref2 = jax.block_until_ready(_reference(y_pred2, y_true2))
    assert jnp.allclose(loss2, ref2, rtol=1e-4, atol=1e-5), (loss2, ref2)

    print("KERNEL_OK")
</pallas_src>

<mosaic_0001>
module attributes {stable_mosaic.version = 11 : i64} {
  func.func @_ufl_stats_kernel(%arg0: i32, %arg1: i32, %arg2: memref<1x8x128xf32, #tpu.memory_space<vmem>>, %arg3: memref<1x8x128xf32, #tpu.memory_space<vmem>>, %arg4: memref<1x4x8x128xf32, #tpu.memory_space<vmem>>) attributes {dimension_semantics = [#tpu.dimension_semantics<parallel>, #tpu.dimension_semantics<arbitrary>], iteration_bounds = array<i64: 2, 1>, scalar_prefetch = 0 : i64, scratch_operands = 0 : i64, tpu.core_type = #tpu.core_type<tc>, window_params = [{transform_indices = @transform_0, window_bounds = array<i64: 1, 8, 128>}, {transform_indices = @transform_1, window_bounds = array<i64: 1, 8, 128>}, {transform_indices = @transform_2, window_bounds = array<i64: 1, 4, 8, 128>}]} {
    %c0_i32 = arith.constant 0 : i32
    %0 = arith.cmpi eq, %arg1, %c0_i32 : i32
    %1 = arith.extui %0 : i1 to i32
    %c0_i32_0 = arith.constant 0 : i32
    %2 = arith.cmpi ne, %1, %c0_i32_0 : i32
    scf.if %2 {
      %cst_43 = arith.constant 0.000000e+00 : f32
      %57 = vector.broadcast %cst_43 : f32 to vector<1x4x8x128xf32>
      %c0_44 = arith.constant 0 : index
      %c0_45 = arith.constant 0 : index
      %c0_46 = arith.constant 0 : index
      %c0_47 = arith.constant 0 : index
      %58 = vector.load %arg4[%c0_44, %c0_45, %c0_46, %c0_47] : memref<1x4x8x128xf32, #tpu.memory_space<vmem>>, vector<1x4x8x128xf32>
      tpu.vector_store %arg4[%c0_44, %c0_45, %c0_46, %c0_47], %57 {strides = array<i32>} : memref<1x4x8x128xf32, #tpu.memory_space<vmem>>, vector<1x4x8x128xf32>,
    } else {
    }
    %c0 = arith.constant 0 : index
    %c0_1 = arith.constant 0 : index
    %c0_2 = arith.constant 0 : index
    %3 = vector.load %arg2[%c0, %c0_1, %c0_2] : memref<1x8x128xf32, #tpu.memory_space<vmem>>, vector<1x8x128xf32>
    %4 = vector.shape_cast %3 : vector<1x8x128xf32> to vector<8x128xf32>
    %cst = arith.constant 1.000000e-07 : f32
    %cst_3 = arith.constant 0.99999988 : f32
    %5 = vector.broadcast %cst : f32 to vector<8x128xf32>
    %6 = arith.maximumf %5, %4 : vector<8x128xf32>
    %7 = vector.broadcast %cst_3 : f32 to vector<8x128xf32>
    %8 = arith.minimumf %7, %6 : vector<8x128xf32>
    %c0_4 = arith.constant 0 : index
    %c0_5 = arith.constant 0 : index
    %c0_6 = arith.constant 0 : index
    %9 = vector.load %arg3[%c0_4, %c0_5, %c0_6] : memref<1x8x128xf32, #tpu.memory_space<vmem>>, vector<1x8x128xf32>
    %10 = vector.shape_cast %9 : vector<1x8x128xf32> to vector<8x128xf32>
    %cst_7 = arith.constant 1.000000e+00 : f32
    %11 = vector.broadcast %cst_7 : f32 to vector<8x128xf32>
    %12 = arith.subf %11, %8 : vector<8x128xf32>
    %13 = math.log %8 : vector<8x128xf32>
    %14 = math.log %12 : vector<8x128xf32>
    %15 = arith.subf %13, %14 : vector<8x128xf32>
    %16 = arith.mulf %10, %15 : vector<8x128xf32>
    %17 = arith.addf %16, %14 : vector<8x128xf32>
    %cst_8 = arith.constant 0.000000e+00 : f32
    %18 = vector.broadcast %cst_8 : f32 to vector<8x128xf32>
    %19 = arith.subf %18, %17 : vector<8x128xf32>
    %cst_9 = arith.constant 7.500000e-01 : f32
    %20 = vector.broadcast %cst_9 : f32 to vector<8x128xf32>
    %21 = arith.mulf %20, %14 : vector<8x128xf32>
    %22 = math.exp %21 : vector<8x128xf32>
    %23 = arith.mulf %22, %19 : vector<8x128xf32>
    %c0_10 = arith.constant 0 : index
    %c0_11 = arith.constant 0 : index
    %c0_12 = arith.constant 0 : index
    %c0_13 = arith.constant 0 : index
    %24 = vector.load %arg4[%c0_10, %c0_11, %c0_12, %c0_13] : memref<1x4x8x128xf32, #tpu.memory_space<vmem>>, vector<1x1x8x128xf32>
    %25 = vector.shape_cast %24 : vector<1x1x8x128xf32> to vector<8x128xf32>
    %26 = arith.mulf %10, %8 : vector<8x128xf32>
    %27 = vector.shape_cast %26 : vector<8x128xf32> to vector<1x8x128xf32>
    %cst_14 = arith.constant dense<0.000000e+00> : vector<8x128xf32>
    %28 = vector.multi_reduction <add>, %27, %cst_14 [0] : vector<1x8x128xf32> to vector<8x128xf32>
    %29 = arith.addf %25, %28 : vector<8x128xf32>
    %c0_15 = arith.constant 0 : index
    %c0_16 = arith.constant 0 : index
    %c0_17 = arith.constant 0 : index
    %c0_18 = arith.constant 0 : index
    %30 = vector.load %arg4[%c0_15, %c0_16, %c0_17, %c0_18] : memref<1x4x8x128xf32, #tpu.memory_space<vmem>>, vector<1x1x8x128xf32>
    %31 = vector.shape_cast %30 : vector<1x1x8x128xf32> to vector<8x128xf32>
    %32 = vector.shape_cast %29 : vector<8x128xf32> to vector<1x1x8x128xf32>
    tpu.vector_store %arg4[%c0_15, %c0_16, %c0_17, %c0_18], %32 {strides = array<i32>} : memref<1x4x8x128xf32, #tpu.memory_space<vmem>>, vector<1x1x8x128xf32>,
    %c0_19 = arith.constant 0 : index
    %c1 = arith.constant 1 : index
    %c0_20 = arith.constant 0 : index
    %c0_21 = arith.constant 0 : index
    %33 = vector.load %arg4[%c0_19, %c1, %c0_20, %c0_21] : memref<1x4x8x128xf32, #tpu.memory_space<vmem>>, vector<1x1x8x128xf32>
    %34 = vector.shape_cast %33 : vector<1x1x8x128xf32> to vector<8x128xf32>
    %35 = vector.shape_cast %10 : vector<8x128xf32> to vector<1x8x128xf32>
    %cst_22 = arith.constant dense<0.000000e+00> : vector<8x128xf32>
    %36 = vector.multi_reduction <add>, %35, %cst_22 [0] : vector<1x8x128xf32> to vector<8x128xf32>
    %37 = arith.addf %34, %36 : vector<8x128xf32>
    %c0_23 = arith.constant 0 : index
    %c1_24 = arith.constant 1 : index
    %c0_25 = arith.constant 0 : index
    %c0_26 = arith.constant 0 : index
    %38 = vector.load %arg4[%c0_23, %c1_24, %c0_25, %c0_26] : memref<1x4x8x128xf32, #tpu.memory_space<vmem>>, vector<1x1x8x128xf32>
    %39 = vector.shape_cast %38 : vector<1x1x8x128xf32> to vector<8x128xf32>
    %40 = vector.shape_cast %37 : vector<8x128xf32> to vector<1x1x8x128xf32>
    tpu.vector_store %arg4[%c0_23, %c1_24, %c0_25, %c0_26], %40 {strides = array<i32>} : memref<1x4x8x128xf32, #tpu.memory_space<vmem>>, vector<1x1x8x128xf32>,
    %c0_27 = arith.constant 0 : index
    %c2 = arith.constant 2 : index
    %c0_28 = arith.constant 0 : index
    %c0_29 = arith.constant 0 : index
    %41 = vector.load %arg4[%c0_27, %c2, %c0_28, %c0_29] : memref<1x4x8x128xf32, #tpu.memory_space<vmem>>, vector<1x1x8x128xf32>
    %42 = vector.shape_cast %41 : vector<1x1x8x128xf32> to vector<8x128xf32>
    %43 = vector.shape_cast %8 : vector<8x128xf32> to vector<1x8x128xf32>
    %cst_30 = arith.constant dense<0.000000e+00> : vector<8x128xf32>
    %44 = vector.multi_reduction <add>, %43, %cst_30 [0] : vector<1x8x128xf32> to vector<8x128xf32>
    %45 = arith.addf %42, %44 : vector<8x128xf32>
    %c0_31 = arith.constant 0 : index
    %c2_32 = arith.constant 2 : index
    %c0_33 = arith.constant 0 : index
    %c0_34 = arith.constant 0 : index
    %46 = vector.load %arg4[%c0_31, %c2_32, %c0_33, %c0_34] : memref<1x4x8x128xf32, #tpu.memory_space<vmem>>, vector<1x1x8x128xf32>
    %47 = vector.shape_cast %46 : vector<1x1x8x128xf32> to vector<8x128xf32>
    %48 = vector.shape_cast %45 : vector<8x128xf32> to vector<1x1x8x128xf32>
    tpu.vector_store %arg4[%c0_31, %c2_32, %c0_33, %c0_34], %48 {strides = array<i32>} : memref<1x4x8x128xf32, #tpu.memory_space<vmem>>, vector<1x1x8x128xf32>,
    %c0_35 = arith.constant 0 : index
    %c3 = arith.constant 3 : index
    %c0_36 = arith.constant 0 : index
    %c0_37 = arith.constant 0 : index
    %49 = vector.load %arg4[%c0_35, %c3, %c0_36, %c0_37] : memref<1x4x8x128xf32, #tpu.memory_space<vmem>>, vector<1x1x8x128xf32>
    %50 = vector.shape_cast %49 : vector<1x1x8x128xf32> to vector<8x128xf32>
    %51 = vector.shape_cast %23 : vector<8x128xf32> to vector<1x8x128xf32>
    %cst_38 = arith.constant dense<0.000000e+00> : vector<8x128xf32>
    %52 = vector.multi_reduction <add>, %51, %cst_38 [0] : vector<1x8x128xf32> to vector<8x128xf32>
    %53 = arith.addf %50, %52 : vector<8x128xf32>
    %c0_39 = arith.constant 0 : index
    %c3_40 = arith.constant 3 : index
    %c0_41 = arith.constant 0 : index
    %c0_42 = arith.constant 0 : index
    %54 = vector.load %arg4[%c0_39, %c3_40, %c0_41, %c0_42] : memref<1x4x8x128xf32, #tpu.memory_space<vmem>>, vector<1x1x8x128xf32>
    %55 = vector.shape_cast %54 : vector<1x1x8x128xf32> to vector<8x128xf32>
    %56 = vector.shape_cast %53 : vector<8x128xf32> to vector<1x1x8x128xf32>
    tpu.vector_store %arg4[%c0_39, %c3_40, %c0_41, %c0_42], %56 {strides = array<i32>} : memref<1x4x8x128xf32, #tpu.memory_space<vmem>>, vector<1x1x8x128xf32>,
    return
  }
  func.func @transform_0(%arg0: i32, %arg1: i32) -> (i32, i32, i32) {
    %c0_i32 = arith.constant 0 : i32
    %c0_i32_0 = arith.constant 0 : i32
    return %arg0, %arg1, %c0_i32 : i32, i32, i32
  }
  func.func @transform_1(%arg0: i32, %arg1: i32) -> (i32, i32, i32) {
    %c0_i32 = arith.constant 0 : i32
    %c0_i32_0 = arith.constant 0 : i32
    return %arg0, %arg1, %c0_i32 : i32, i32, i32
  }
  func.func @transform_2(%arg0: i32, %arg1: i32) -> (i32, i32, i32, i32) {
    %c0_i32 = arith.constant 0 : i32
    %c0_i32_0 = arith.constant 0 : i32
    %c0_i32_1 = arith.constant 0 : i32
    %c0_i32_2 = arith.constant 0 : i32
    return %arg0, %c0_i32, %c0_i32_0, %c0_i32_1 : i32, i32, i32, i32
  }
}

</mosaic_0001>

<bundles_post_ra>
// kernel: tpu_custom_call.1
= control target key start
LH: loop header
LB: loop body
LE: loop exit
PB: predicated region body
PF: predicated region fallthrough
CT: control target
= control target key end

     0   :  { %7 = vsyncpa [#allocation3], 0  ;;  %s870_s0 = inlined_call_operand.hbm [shape: f32[2,8,128], index: 0, kind: input, shape index: {}]   ;;  %s871_s1 = inlined_call_operand.hbm [shape: f32[2,8,128], index: 1, kind: input, shape index: {}]   ;;  %s872_s2 = inlined_call_operand.hbm [shape: f32[2,4,8,128], index: 2, kind: output, shape index: {}]  }
   0x1   :  { %9 = vsyncpa [#allocation3 + $0x1], 0 }
   0x2   :  { %10 = vsyncpa [#allocation6], 0 }
   0x3   :  { %12 = vsyncpa [#allocation6 + $0x1], 0 }
   0x4   :  { %13 = vsyncpa [#allocation4], 0 }
   0x5   :  { %15 = vsyncpa [#allocation4 + $0x1], 0  ;;  %s647_s9 = smov 0   ;;  %s649_s10 = smov 0  }
   0x6   :  { %s651_s11 = smov 0   ;;  %s653_s12 = smov 0  }
   0x7   :  { %s655_s13 = smov 0   ;;  %s657_s14 = smov 0  }
   0x8 LB: > { %s379_s15 = sadd.s32 4294967295, %s625_s14   ;;  %s380_s16 = sadd.s32 4294967294, %s625_s14   ;;  %s625_s14 = sphi %s657_s14, %s21_s14   ;;  %s621_s13 = sphi %s655_s13, %s892_s13   ;;  %s617_s12 = sphi %s653_s12, %s891_s12   ;;  %s613_s11 = sphi %s651_s11, %s890_s11   ;;  %s609_s10 = sphi %s649_s10, %s889_s10   ;;  %s605_s9 = sphi %s647_s9, %s888_s9  }
   0x9   : > { %s33_s17 = sadd.s32 1, %s621_s13  ;;  %s42_s18 = sadd.s32 1, %s613_s11 }
   0xa   : > { %p35_p0 = scmp.ge.s32.totalorder %s33_s17, 2  ;;  %p49_p1 = scmp.ne.s32.totalorder %s613_s11, %s609_s10 }
   0xb   : > { %p50_p2 = scmp.eq.s32.totalorder %s625_s14, 0  ;;  %p55_p3 = scmp.ne.s32.totalorder %s609_s10, %s605_s9 }
   0xc   : > { %s894_s17 = smov (%p35_p0, %s33_s17), 0  ;;  %p56_p5 = scmp.eq.s32.totalorder %s379_s15, 0 }
   0xd   : > { %p688_p4 = por %p50_p2, %p49_p1  ;;  %s37_s20 = ssub.s32 %s621_s13, %s894_s17 }
   0xe   : > { %p107_p6 = scmp.eq.s32.totalorder %s379_s15, 1  ;;  %p40_p7 = scmp.eq.s32.totalorder %s37_s20, 0 }
   0xf   : > { %p694_p8 = por %p56_p5, %p55_p3  ;;  %p113_p10 = scmp.eq.s32.totalorder %s380_s16, 1 }
  0x10   : > { %p698_p9 = por %p107_p6, %p49_p1  ;;  %p420_p13 = scmp.lt.s32.totalorder %s625_s14, 2 }
  0x11   : > { %s876_s21 = scalar_select %p694_p8, 1, 0 }
  0x12   : > { %s877_s22 = scalar_select %p698_p9, 1, 0 }
  0x13   : > { %s703_s23 = scalar_select %p40_p7, %s613_s11, %s42_s18  }
  0x14   : > { %p705_p11 = por %p113_p10, %p55_p3  ;;  %s712_s25 = sand.u32 1, %s613_s11  }
  0x15   : > { %s383_s26 = sshll.u32 %s712_s25, 3  ;;  %s384_s27 = sshll.u32 %s621_s13, 7 }
  0x16   : > { %s878_s24 = scalar_select %p705_p11, 1, 0 }
  0x17   : > { %s721_s30 = scalar_lea.hbm %s870_s0, %s384_s27  ;;  %s137_s3 = scalar_lea.vmem [#allocation2], %s383_s26 }
  0x18   : > { %s145_s4 = sshll.u32 %s137_s3, 4  ;;  %p729_p0 = pnand %p420_p13, %p688_p4  ;;  %s725_s4 = int_to_ptr.vmem [resolvable:$true] %s145_s4 }
  0x19   : > { %s134_s6 = scalar_lea.sflag [#allocation3], %s712_s25  ;;  %s479_s7 = scalar_lea.hbm %s721_s30, 128 }
  0x1a   : > { %p480_p3 = scmp.ne.s32.totalorder %s721_s30, %s479_s7  ;;  %p481_p5 = pneg %p729_p0 }
  0x1b   : > { %s484_s16 = scalar_lea.hbm %s870_s0, 256  ;;  %p485_p4 = scmp.lt.u32.totalorder %s721_s30, %s870_s0 }
  0x1c   : > { %p482_p6 = pnand %p481_p5, %p480_p3  ;;  %p486_p10 = scmp.lt.u32.totalorder %s484_s16, %s479_s7 }
  0x1d   : > { %p488_p12 = scmp.lt.u32.totalorder %s479_s7, %s721_s30 }
  0x1e   : > { %p483_p7 = pneg %p482_p6  ;;  %p487_p13 = por %p486_p10, %p485_p4 }
  0x20   : > { %p489_p1 = por %p488_p12, %p487_p13 }
  0x22   : > { %p490_p2 = pnand %p489_p1, %p483_p7 }
  0x24   : > { %493 = shalt.err (!%p490_p2)
}
  0x25   : > { %s494_s20 = scalar_lea.vmem %s725_s4, 128  ;;  %s627_s28 = smov [#allocation2]  }
  0x26   : > { %p495_p3 = scmp.ne.s32.totalorder %s725_s4, %s494_s20  ;;  %s499_s29 = sshll.u32 %s627_s28, 4  ;;  %s500_s29 = int_to_ptr.vmem [resolvable:$false] %s499_s29 }
  0x27   : > { %s501_s3 = scalar_lea.vmem %s500_s29, 256  ;;  %p502_p9 = scmp.lt.s32.totalorder %s725_s4, %s500_s29 }
  0x28   : > { %p497_p6 = pnand %p495_p3, %p481_p5  ;;  %p503_p4 = scmp.lt.s32.totalorder %s501_s3, %s494_s20 }
  0x2a   : > { %p498_p11 = pneg %p497_p6  ;;  %p504_p10 = por %p503_p4, %p502_p9 }
  0x2c   : > { %p505_p12 = pnand %p504_p10, %p498_p11 }
  0x2e   : > { %508 = shalt.err (!%p505_p12)
}
  0x2f   : > { %412 = dma.hbm_to_vmem [thread:$0]  (!%p729_p0), %s721_s30, 128, %s725_s4, %s134_s6  }
  0x30   : > { %p880_p1 = scmp.lt.s32.totalorder %s625_s14, 3  ;;  %p881_p2 = scmp.ge.s32.totalorder %s625_s14, 1 }
  0x31   : > { %s774_s16 = scalar_lea.hbm %s871_s1, %s384_s27  ;;  %s156_s18 = scalar_lea.vmem [#allocation5], %s383_s26 }
  0x32   : > { %p765_p7 = pnand %p881_p2, %p880_p1  ;;  %s164_s19 = sshll.u32 %s156_s18, 4  ;;  %s165_s19 = int_to_ptr.vmem [resolvable:$true] %s164_s19 }
  0x33   : > { %s153_s30 = scalar_lea.sflag [#allocation6], %s712_s25  ;;  %s509_s4 = scalar_lea.hbm %s774_s16, 128 }
  0x34   : > { %s882_s7 = scalar_select %p765_p7, 1, 0 }
  0x35   : > { %p510_p9 = scmp.ne.s32.totalorder %s774_s16, %s509_s4  ;;  %s514_s27 = scalar_lea.hbm %s871_s1, 256 }
  0x36   : > { %p515_p3 = scmp.lt.u32.totalorder %s774_s16, %s871_s1  ;;  %p516_p6 = scmp.lt.u32.totalorder %s514_s27, %s509_s4 }
  0x37   : > { %p512_p11 = pnand %p510_p9, %p481_p5  ;;  %p518_p10 = scmp.lt.u32.totalorder %s509_s4, %s774_s16 }
  0x38   : > { %p517_p4 = por %p516_p6, %p515_p3 }
  0x39   : > { %p513_p13 = pneg %p512_p11 }
  0x3a   : > { %p519_p12 = por %p518_p10, %p517_p4 }
  0x3c   : > { %p520_p1 = pnand %p519_p12, %p513_p13 }
  0x3e   : > { %523 = shalt.err (!%p520_p1)
}
  0x3f   : > { %s524_s25 = scalar_lea.vmem %s165_s19, 128  ;;  %s628_s26 = smov [#allocation5]  }
  0x40   : > { %p525_p2 = scmp.ne.s32.totalorder %s165_s19, %s524_s25  ;;  %s529_s3 = sshll.u32 %s628_s26, 4  ;;  %s530_s3 = int_to_ptr.vmem [resolvable:$false] %s529_s3 }
  0x41   : > { %s531_s8 = scalar_lea.vmem %s530_s3, 256  ;;  %p532_p8 = scmp.lt.s32.totalorder %s165_s19, %s530_s3 }
  0x42   : > { %p527_p9 = pnand %p525_p2, %p481_p5  ;;  %p533_p7 = scmp.lt.s32.totalorder %s531_s8, %s524_s25 }
  0x44   : > { %p528_p11 = pneg %p527_p9  ;;  %p534_p3 = por %p533_p7, %p532_p8 }
  0x46   : > { %p535_p6 = pnand %p534_p3, %p528_p11 }
  0x48   : > { %538 = shalt.err (!%p535_p6)
}
  0x49   : > { %415 = dma.hbm_to_vmem [thread:$0]  (!%p729_p0), %s774_s16, 128, %s165_s19, %s153_s30  }
  0x4a   : > { %p883_p13 = scmp.ne.s32.totalorder %s882_s7, 0 }
  0x4b   : > { %s801_s15 = sand.u32 (!%p883_p13), 1, %s609_s10   ;;  %p884_p5 = scmp.ne.s32.totalorder (!%p883_p13), %s876_s21, 0 }
  0x4c   : > { %173 = sbr.rel (%p883_p13) target bundleno = 138 (0x8a), region = 28  ;;  %s388_s18 = sshll.u32 (!%p883_p13), %s801_s15, 3 }
  0x4d   : > { %s176_s4 = scalar_lea.sflag (!%p883_p13), [#allocation3], %s801_s15  ;;  %s179_s6 = scalar_lea.vmem (!%p883_p13), [#allocation2], %s388_s18 }
  0x53   : > { %592 = dma.done.wait (%p884_p5), %s176_s4, 128  }
  0x54   : > { %594 = vsyncadd (%p884_p5), %s176_s4, 4294967168  ;;  %s185_s5 = scalar_lea.sflag [#allocation6], %s801_s15  ;;  %s188_s16 = scalar_lea.vmem [#allocation5], %s388_s18 }
  0x55   : > { %596 = dma.done.wait (%p884_p5), %s185_s5, 128  }
  0x56   : > { %598 = vsyncadd (%p884_p5), %s185_s5, 4294967168  ;;  %s390_s7 = sshll.u32 %s801_s15, 5  ;;  %v222_v0 = vld [vmem:[%s179_s6] sm:$0xff]  ;;  %v225_v1 = vld [vmem:[%s188_s16] sm:$0xff]  ;;  %s402_s21 = sshll.u32 %s617_s12, 9 }
  0x57   : > { %v223_v2 = vmax.f32 %v222_v0, 1e-07  ;;  %s213_s19 = scalar_lea.vmem [#allocation7], %s390_s7  ;;  %s819_s28 = scalar_lea.hbm %s872_s2, %s402_s21 }
  0x58   : > { %392 = vst [vmem:[%s213_s19 + $0x8] sm:$0xff] %v225_v1  ;;  %s273_s30 = sshll.u32 %s213_s19, 4  ;;  %s260_s29 = scalar_lea.sflag [#allocation4], %s801_s15  ;;  %s821_s30 = int_to_ptr.vmem [resolvable:$true] %s273_s30 }
  0x59   : > { %v224_v3 = vmin.f32 %v223_v2, 0.9999999  ;;  %s539_s25 = scalar_lea.vmem %s821_s30, 512  ;;  %p885_p0 = scmp.ne.s32.totalorder %s877_s22, 0 }
  0x5a   : > { %p540_p8 = scmp.ne.s32.totalorder %s821_s30, %s539_s25  ;;  %s629_s12 = smov [#allocation7]  }
  0x5b   : > { %v240_v4 = vmul.f32 %v225_v1, %v224_v3  ;;  %v226_v5 = vsub.f32 1.0, %v224_v3  ;;  %473 = vlog2.f32 %v224_v3  ;;  %394 = vst [vmem:[%s213_s19 + $0x10] sm:$0xff] %v224_v3  ;;  %s543_s26 = sshll.u32 %s629_s12, 4  ;;  %s544_s26 = int_to_ptr.vmem [resolvable:$false] %s543_s26 }
  0x5c   : > { %p541_p7 = pnand %p540_p8, %p885_p0  ;;  %s545_s3 = scalar_lea.vmem %s544_s26, 1024 }
  0x5d   : > { %475 = vlog2.f32 %v226_v5  ;;  %243 = vst [vmem:[%s213_s19] sm:$0xff] %v240_v4  ;;  %p546_p10 = scmp.lt.s32.totalorder %s821_s30, %s544_s26  ;;  %p547_p12 = scmp.lt.s32.totalorder %s545_s3, %s539_s25 }
  0x5e   : > { %p542_p4 = pneg %p541_p7 }
  0x5f   : > { %p548_p1 = por %p547_p12, %p546_p10 }
  0x61   : > { %p549_p2 = pnand %p548_p1, %p542_p4 }
  0x65   : > { %v474_v6 = vpop.eup %473 }
  0x66   : > { %v228_v7 = vmul.f32 0.6931472, %v474_v6 }
  0x67   : > { %v476_v8 = vpop.eup %475 }
  0x68   : > { %v230_v9 = vmul.f32 0.6931472, %v476_v8 }
  0x6a   : > { %v231_v10 = vsub.f32 %v228_v7, %v230_v9  ;;  %v235_v11 = vmul.f32 0.75, %v230_v9 }
  0x6c   : > { %v236_v12 = vmul.f32 1.442695, %v235_v11  ;;  %v232_v13 = vmul.f32 %v231_v10, %v225_v1 }
  0x6e   : > { %477 = vpow2.f32 %v236_v12  ;;  %v233_v14 = vadd.f32 %v232_v13, %v230_v9 }
  0x70   : > { %v234_v15 = vsub.f32 0.0, %v233_v14 }
  0x78   : > { %v478_v16 = vpop.eup %477 }
  0x79   : > { %v238_v17 = vmul.f32 %v478_v16, %v234_v15 }
  0x7b   : > { %396 = vst [vmem:[%s213_s19 + $0x18] sm:$0xff] %v238_v17 }
  0x7c   : > { %552 = shalt.err (!%p549_p2)
}
  0x7d   : > { %s553_s8 = scalar_lea.hbm %s819_s28, 512  ;;  %s557_s6 = scalar_lea.hbm %s872_s2, 1024 }
  0x7e   : > { %p554_p9 = scmp.ne.s32.totalorder %s819_s28, %s553_s8  ;;  %p558_p6 = scmp.lt.u32.totalorder %s819_s28, %s872_s2 }
  0x7f   : > { %p559_p13 = scmp.lt.u32.totalorder %s557_s6, %s553_s8  ;;  %p561_p8 = scmp.lt.u32.totalorder %s553_s8, %s819_s28 }
  0x80   : > { %p555_p11 = pnand %p554_p9, %p885_p0 }
  0x81   : > { %p560_p5 = por %p559_p13, %p558_p6 }
  0x82   : > { %p556_p3 = pneg %p555_p11 }
  0x83   : > { %p562_p7 = por %p561_p8, %p560_p5 }
  0x85   : > { %p563_p4 = pnand %p562_p7, %p556_p3 }
  0x87   : > { %566 = shalt.err (!%p563_p4)
}
  0x88   : > { %s630_s7 = smov 128   ;;  %s631_s19 = smov 8  }
  0x89   : > { %407 = dma.vmem_to_hbm [thread:$0]  (%p885_p0), %s821_s30, 512, %s819_s28, %s260_s29, %s630_s7, %s630_s7, %s631_s19  }
  0x8a PF: > { %s288_s21 = sand.u32 1, %s605_s9   ;;  %p886_p10 = scmp.ne.s32.totalorder %s878_s24, 0 }
  0x8b   : > { %p887_p12 = scmp.ge.s32.totalorder %s625_s14, 2  ;;  %s289_s20 = scalar_lea.sflag [#allocation4], %s288_s21 }
  0x8d   : > { %p417_p1 = pnand %p887_p12, %p886_p10 }
  0x8f   : > { %600 = dma.done.wait (!%p417_p1), %s289_s20, 512  }
  0x90   : > { %602 = vsyncadd (!%p417_p1), %s289_s20, 4294966784  ;;  %s21_s14 = sadd.s32 1, %s625_s14   ;;  %s888_s9 = smov %s609_s10 }
  0x91   : > { %p18_p2 = scmp.ge.s32.totalorder %s21_s14, 4   ;;  %s889_s10 = smov %s613_s11 }
  0x92   : > { %s890_s11 = smov %s703_s23  ;;  %s891_s12 = smov %s621_s13 }
  0x93   : > { %s892_s13 = smov %s894_s17  ;;  %20 = sbr.rel (!%p18_p2) target bundleno = 8 (0x8), region = 93 }
  0x9a   :  { %294 = vsyncpa [#allocation3], 1 }
  0x9b   :  { %296 = vsyncpa [#allocation3 + $0x1], 1 }
  0x9c   :  { %297 = vsyncpa [#allocation6], 1 }
  0x9d   :  { %299 = vsyncpa [#allocation6 + $0x1], 1 }
  0x9e   :  { %300 = vsyncpa [#allocation4], 1 }
  0x9f   :  { %302 = vsyncpa [#allocation4 + $0x1], 1 }

</bundles_post_ra>
